<compile_context>
chip_gen: v7x
topology: tpu7x:2x2x1
jax: 0.10.0
libtpu: 0.0.40
codegen_flags: <defaults>
</compile_context>

<pallas_src>
import functools

import jax
import jax.numpy as jnp
from jax.experimental import pallas as pl
from jax.experimental.pallas import tpu as pltpu

H1 = 50   # first hidden width  (Linear(5, 50))
H2 = 20   # second hidden width (Linear(50, 20))


def _round_up(x, m):
    return ((x + m - 1) // m) * m


def vertex_update_kernel(
    starts_ref,  # (n_node_tiles,) i32 SMEM  first edge-tile index per node tile
    counts_ref,  # (n_node_tiles,) i32 SMEM  number of edge tiles per node tile
    v_ref,       # (tm, Fv)  f32   vertex attributes (node tile)
    e_ref,       # (te, Fe)  f32   edge attributes (dst-sorted edge tile)
    dst_ref,     # (1, te)   i32   destination node id per edge (-1 = padding)
    w1v_ref,     # (Fv, 50)  f32   first Linear, vertex-feature rows
    w1e_ref,     # (Fe, 50)  f32   first Linear, aggregated-edge rows
    b1_ref,      # (1, 50)   f32
    w2_ref,      # (50, 20)  f32
    b2_ref,      # (1, 20)   f32
    w3_ref,      # (1, 20)   f32   last Linear as a row vector (VPU mul + reduce)
    b3_ref,      # (1, 1)    f32
    out_ref,     # (tm, 1)   f32
    acc_ref,     # (tm, 50)  f32   VMEM scratch accumulator
):
    i = pl.program_id(0)          # node-tile index (parallel)
    k = pl.program_id(1)          # edge-tile index within this node tile's range
    tm = acc_ref.shape[0]

    # --- init: vertex half of the first Linear, hoisted out of the edge loop.
    @pl.when(k == 0)
    def _init():
        acc_ref[...] = (
            jnp.dot(v_ref[...], w1v_ref[...], preferred_element_type=jnp.float32)
            + b1_ref[...]
        )

    # --- reduction step: fused scatter-sum + first-Linear edge block.  Only
    # runs for the edge tiles that actually hold this node tile's edges.
    @pl.when(k < counts_ref[i])
    def _reduce():
        # (tm, 1) node-id column broadcast against the (1, te) dst row: the
        # only full-tile VALU work is the compare + bf16 pack.
        node_col = i * tm + jax.lax.broadcasted_iota(jnp.int32, (tm, 1), 0)
        onehot = (node_col == dst_ref[...]).astype(jnp.bfloat16)        # (tm, te)
        # Tiny (te, Fe) @ (Fe, 50) product in f32, then hi/lo bf16 split so the
        # big one-hot matmul keeps f32-level accuracy at bf16 MXU rate.
        ew = jnp.dot(e_ref[...], w1e_ref[...], preferred_element_type=jnp.float32)
        ew_hi = ew.astype(jnp.bfloat16)
        ew_lo = (ew - ew_hi.astype(jnp.float32)).astype(jnp.bfloat16)
        acc_ref[...] += (
            jnp.dot(onehot, ew_hi, preferred_element_type=jnp.float32)
            + jnp.dot(onehot, ew_lo, preferred_element_type=jnp.float32)
        )

    # --- finalize: ReLU + remaining MLP layers, once per node tile.
    @pl.when(k == pl.num_programs(1) - 1)
    def _finalize():
        h1 = jnp.maximum(acc_ref[...], 0.0)
        h2 = jnp.maximum(
            jnp.dot(h1, w2_ref[...], preferred_element_type=jnp.float32)
            + b2_ref[...],
            0.0,
        )
        # Last layer is 1-wide: VPU multiply + lane reduce avoids a 1-lane MXU pop.
        out_ref[...] = (
            jnp.sum(h2 * w3_ref[...], axis=-1, keepdims=True) + b3_ref[...]
        )


@functools.partial(jax.jit, static_argnames=("tm", "te", "num_k"))
def _vertex_update_pallas(starts, counts, v_p, e_p, dst_p,
                          w1v, w1e, b1r, w2_t, b2r, w3r, b3r,
                          *, tm, te, num_k):
    n_pad, fv = v_p.shape
    e_pad, fe = e_p.shape
    n_tiles_m = n_pad // tm
    n_tiles_e = e_pad // te

    def _edge_tile(i, k, starts_ref, counts_ref):
        # Clamp so skipped steps (k >= counts[i]) repeat the previous block
        # index -> their DMAs are elided by the pipeline; also guards the
        # deg==0 / ragged-end cases.
        kk = jnp.minimum(k, jnp.maximum(counts_ref[i] - 1, 0))
        return jnp.minimum(starts_ref[i] + kk, n_tiles_e - 1)

    def e_idx(i, k, starts_ref, counts_ref):
        return (_edge_tile(i, k, starts_ref, counts_ref), 0)

    def dst_idx(i, k, starts_ref, counts_ref):
        return (0, _edge_tile(i, k, starts_ref, counts_ref))

    grid_spec = pltpu.PrefetchScalarGridSpec(
        num_scalar_prefetch=2,
        grid=(n_tiles_m, num_k),
        in_specs=[
            pl.BlockSpec((tm, fv), lambda i, k, s, c: (i, 0)),   # vertex tile
            pl.BlockSpec((te, fe), e_idx),                       # sorted edge tile
            pl.BlockSpec((1, te), dst_idx),                      # dst tile
            # Weights/biases: constant index_maps -> fetched once, VMEM-resident.
            pl.BlockSpec((fv, H1), lambda i, k, s, c: (0, 0)),
            pl.BlockSpec((fe, H1), lambda i, k, s, c: (0, 0)),
            pl.BlockSpec((1, H1), lambda i, k, s, c: (0, 0)),
            pl.BlockSpec((H1, H2), lambda i, k, s, c: (0, 0)),
            pl.BlockSpec((1, H2), lambda i, k, s, c: (0, 0)),
            pl.BlockSpec((1, H2), lambda i, k, s, c: (0, 0)),
            pl.BlockSpec((1, 1), lambda i, k, s, c: (0, 0)),
        ],
        out_specs=pl.BlockSpec((tm, 1), lambda i, k, s, c: (i, 0)),
        scratch_shapes=[pltpu.VMEM((tm, H1), jnp.float32)],
    )

    # Advisory cost estimate so XLA schedules the wrapper's padding/sort ops
    # around a kernel it would otherwise treat as cheap.
    flops = (2 * n_tiles_m * num_k * te * tm * H1 * 2        # hi/lo one-hot matmuls
             + 2 * n_pad * (fv * H1 + H1 * H2 + H2))
    bytes_accessed = 4 * (n_pad * fv + n_tiles_m * num_k * te * (fe + 1)
                          + n_pad + H1 * (fv + fe + H2))
    cost = pl.CostEstimate(flops=flops, transcendentals=0,
                           bytes_accessed=bytes_accessed)

    return pl.pallas_call(
        vertex_update_kernel,
        out_shape=jax.ShapeDtypeStruct((n_pad, 1), jnp.float32),
        grid_spec=grid_spec,
        compiler_params=pltpu.CompilerParams(
            dimension_semantics=("parallel", "arbitrary"),
            vmem_limit_bytes=48 * 1024 * 1024,
        ),
        cost_estimate=cost,
    )(starts, counts, v_p, e_p, dst_p, w1v, w1e, b1r, w2_t, b2r, w3r, b3r)


def vertex_update(vertex_attr, edge_index, edge_attr, params, *, tm=1024, te=4096):
    """Tiled Pallas VertexUpdate forward with dst-sorted edge restriction.

    tm/te defaults (1024, 4096) keep the per-step footprint (one-hot tile,
    edge/vertex buffers, accumulator) around ~15-20 MiB -- comfortably inside
    the 48 MiB scoped VMEM on all of v5e/v6e/v7x.  On v6e/v5e (128 MiB VMEM)
    te can be pushed to 8192; on v7x keep n_pad/tm >= 2 so both TensorCores
    get node tiles.
    """
    n_nodes, fv = vertex_attr.shape
    n_edges, fe = edge_attr.shape
    assert fv + fe == 5, "Linear(5, 50) expects vertex + aggregated edge feats == 5"

    # Tile sizes: sublane-aligned node tiles, lane-aligned edge tiles, clamped
    # to the (padded) problem size.
    tm = max(8, _round_up(min(tm, _round_up(n_nodes, 8)), 8))
    te = max(128, _round_up(min(te, _round_up(n_edges, 128)), 128))
    n_pad = _round_up(n_nodes, tm)
    e_pad = _round_up(n_edges, te)
    n_tiles_m = n_pad // tm
    n_tiles_e = e_pad // te

    # --- sort edges by destination so each node tile owns a contiguous range.
    dst = edge_index[1].astype(jnp.int32)
    order = jnp.argsort(dst)
    e_sorted = edge_attr.astype(jnp.float32)[order]
    dst_sorted = dst[order]

    # Per-node-tile edge-tile (start, count) ranges -> scalar prefetch.
    tile_id = dst_sorted // tm
    deg = jax.ops.segment_sum(jnp.ones((n_edges,), jnp.int32), tile_id,
                              num_segments=n_tiles_m)
    cum = jnp.cumsum(deg) - deg                          # exclusive prefix sum
    starts = jnp.minimum(cum // te, n_tiles_e - 1).astype(jnp.int32)
    last = jnp.where(deg > 0, (cum + deg - 1) // te, starts)
    counts = jnp.where(deg > 0, last - starts + 1, 0).astype(jnp.int32)
    # Grid axis 1 = max edge tiles any node tile must scan (static for Pallas).
    num_k = max(1, int(jax.device_get(jnp.max(counts))))

    # Pad operands.  Padded edges carry zero attrs (contribute nothing) and
    # dst = -1 (match no node).
    v_p = jnp.zeros((n_pad, fv), jnp.float32).at[:n_nodes].set(
        vertex_attr.astype(jnp.float32))
    e_p = jnp.zeros((e_pad, fe), jnp.float32).at[:n_edges].set(e_sorted)
    dst_p = jnp.full((1, e_pad), -1, jnp.int32).at[0, :n_edges].set(dst_sorted)

    w1, b1, w2, b2, w3, b3 = params
    # PyTorch Linear weight is (out, in); kernel wants (in, out).  Split W1
    # into vertex / aggregated-edge blocks (== concat-then-matmul).
    w1_t = w1.T.astype(jnp.float32)            # (5, 50)
    w1v = w1_t[:fv, :]                         # (Fv, 50)
    w1e = w1_t[fv:, :]                         # (Fe, 50)
    w2_t = w2.T.astype(jnp.float32)            # (50, 20)
    w3r = w3.reshape(1, H2).astype(jnp.float32)  # (1, 20) row for VPU mul+reduce
    b1r = b1.reshape(1, H1).astype(jnp.float32)
    b2r = b2.reshape(1, H2).astype(jnp.float32)
    b3r = b3.reshape(1, 1).astype(jnp.float32)

    out_pad = _vertex_update_pallas(starts, counts, v_p, e_p, dst_p,
                                    w1v, w1e, b1r, w2_t, b2r, w3r, b3r,
                                    tm=tm, te=te, num_k=num_k)
    return out_pad[:n_nodes]


def init_params(key):
    """Deterministic init matching init_weights: W ~ U[0,1), bias = 0.01."""
    k1, k2, k3 = jax.random.split(key, 3)
    w1 = jax.random.uniform(k1, (H1, 5), dtype=jnp.float32)
    b1 = jnp.full((H1,), 0.01, dtype=jnp.float32)
    w2 = jax.random.uniform(k2, (H2, H1), dtype=jnp.float32)
    b2 = jnp.full((H2,), 0.01, dtype=jnp.float32)
    w3 = jax.random.uniform(k3, (1, H2), dtype=jnp.float32)
    b3 = jnp.full((1,), 0.01, dtype=jnp.float32)
    return (w1, b1, w2, b2, w3, b3)


def vertex_update_ref(vertex_attr, edge_index, edge_attr, params):
    """Pure-JAX reference (mirrors the PyTorch forward with sum edge_agg)."""
    n_nodes = vertex_attr.shape[0]
    agg = jax.ops.segment_sum(edge_attr, edge_index[1], num_segments=n_nodes)
    x = jnp.concatenate([vertex_attr, agg], axis=1)
    w1, b1, w2, b2, w3, b3 = params
    h1 = jnp.maximum(x @ w1.T + b1, 0.0)
    h2 = jnp.maximum(h1 @ w2.T + b2, 0.0)
    return h2 @ w3.T + b3


if __name__ == "__main__":
    key = jax.random.PRNGKey(0)
    k_v, k_e, k_src, k_dst, k_p = jax.random.split(key, 5)

    N = 40    # nodes
    E = 300   # edges
    FV = 3    # vertex feature dim
    FE = 2    # edge feature dim   (FV + FE == 5, matching Linear(5, 50))

    vertex_attr = jax.random.normal(k_v, (N, FV), dtype=jnp.float32)
    edge_attr = jax.random.normal(k_e, (E, FE), dtype=jnp.float32)
    edge_index = jnp.stack([
        jax.random.randint(k_src, (E,), 0, N),
        jax.random.randint(k_dst, (E,), 0, N),
    ], axis=0).astype(jnp.int32)   # (2, E)

    params = init_params(k_p)
    ref = vertex_update_ref(vertex_attr, edge_index, edge_attr, params)

    # Small tiles: exercises multiple node tiles, num_k > 1 edge-tile ranges,
    # the pl.when(k < counts[i]) guard, clamped index maps and padded edges.
    out_small = vertex_update(vertex_attr, edge_index, edge_attr, params,
                              tm=16, te=128)
    out_small = jax.block_until_ready(out_small)
    assert out_small.shape == (N, 1)
    assert jnp.allclose(out_small, ref, atol=1e-3, rtol=1e-3), (
        float(jnp.max(jnp.abs(out_small - ref))), out_small[:4], ref[:4])

    # Default (large) tiles: clamps to a single node/edge tile for this tiny
    # demo and exercises the num_k == 1 init+reduce+finalize-in-one-step path.
    out_big = vertex_update(vertex_attr, edge_index, edge_attr, params)
    out_big = jax.block_until_ready(out_big)
    assert out_big.shape == (N, 1)
    assert jnp.allclose(out_big, ref, atol=1e-3, rtol=1e-3), (
        float(jnp.max(jnp.abs(out_big - ref))), out_big[:4], ref[:4])

    print("KERNEL_OK")
</pallas_src>

<mosaic_0001>
module attributes {stable_mosaic.version = 11 : i64} {
  func.func @vertex_update_kernel(%arg0: i32, %arg1: i32, %arg2: memref<3xi32, #tpu.memory_space<smem>>, %arg3: memref<3xi32, #tpu.memory_space<smem>>, %arg4: memref<16x3xf32, #tpu.memory_space<vmem>>, %arg5: memref<128x2xf32, #tpu.memory_space<vmem>>, %arg6: memref<1x128xi32, #tpu.memory_space<vmem>>, %arg7: memref<3x50xf32, #tpu.memory_space<vmem>>, %arg8: memref<2x50xf32, #tpu.memory_space<vmem>>, %arg9: memref<1x50xf32, #tpu.memory_space<vmem>>, %arg10: memref<50x20xf32, #tpu.memory_space<vmem>>, %arg11: memref<1x20xf32, #tpu.memory_space<vmem>>, %arg12: memref<1x20xf32, #tpu.memory_space<vmem>>, %arg13: memref<1x1xf32, #tpu.memory_space<vmem>>, %arg14: memref<16x1xf32, #tpu.memory_space<vmem>>, %arg15: memref<16x50xf32, #tpu.memory_space<vmem>>) attributes {dimension_semantics = [#tpu.dimension_semantics<parallel>, #tpu.dimension_semantics<arbitrary>], iteration_bounds = array<i64: 3, 2>, scalar_prefetch = 2 : i64, scratch_operands = 1 : i64, tpu.core_type = #tpu.core_type<tc>, window_params = [{transform_indices = @transform_0, window_bounds = array<i64: 16, 3>}, {transform_indices = @transform_1, window_bounds = array<i64: 128, 2>}, {transform_indices = @transform_2, window_bounds = array<i64: 1, 128>}, {pipeline_mode = #tpu.pipeline_mode<synchronous>, transform_indices = @transform_3, window_bounds = array<i64: 3, 50>}, {pipeline_mode = #tpu.pipeline_mode<synchronous>, transform_indices = @transform_4, window_bounds = array<i64: 2, 50>}, {pipeline_mode = #tpu.pipeline_mode<synchronous>, transform_indices = @transform_5, window_bounds = array<i64: 1, 50>}, {pipeline_mode = #tpu.pipeline_mode<synchronous>, transform_indices = @transform_6, window_bounds = array<i64: 50, 20>}, {pipeline_mode = #tpu.pipeline_mode<synchronous>, transform_indices = @transform_7, window_bounds = array<i64: 1, 20>}, {pipeline_mode = #tpu.pipeline_mode<synchronous>, transform_indices = @transform_8, window_bounds = array<i64: 1, 20>}, {pipeline_mode = #tpu.pipeline_mode<synchronous>, transform_indices = @transform_9, window_bounds = array<i64: 1, 1>}, {transform_indices = @transform_10, window_bounds = array<i64: 16, 1>}]} {
    %c0_i32 = arith.constant 0 : i32
    %0 = arith.cmpi eq, %arg1, %c0_i32 : i32
    %1 = arith.extui %0 : i1 to i32
    %c0_i32_0 = arith.constant 0 : i32
    %2 = arith.cmpi ne, %1, %c0_i32_0 : i32
    scf.if %2 {
      %c0 = arith.constant 0 : index
      %c0_3 = arith.constant 0 : index
      %11 = vector.load %arg4[%c0, %c0_3] : memref<16x3xf32, #tpu.memory_space<vmem>>, vector<16x3xf32>
      %c0_4 = arith.constant 0 : index
      %c0_5 = arith.constant 0 : index
      %12 = vector.load %arg7[%c0_4, %c0_5] : memref<3x50xf32, #tpu.memory_space<vmem>>, vector<3x50xf32>
      %cst = arith.constant dense<0.000000e+00> : vector<16x50xf32>
      %13 = tpu.matmul %11, %12, %cst {dimension_numbers = #tpu.dot_dimension_numbers<[1], [0], [0], [1], [0, 0, 1, 1], [], []>} : vector<16x3xf32>, vector<3x50xf32>, vector<16x50xf32> -> vector<16x50xf32>
      %c0_6 = arith.constant 0 : index
      %c0_7 = arith.constant 0 : index
      %14 = vector.load %arg9[%c0_6, %c0_7] : memref<1x50xf32, #tpu.memory_space<vmem>>, vector<1x50xf32>
      %15 = vector.broadcast %14 : vector<1x50xf32> to vector<16x50xf32>
      %16 = arith.addf %13, %15 : vector<16x50xf32>
      %c0_8 = arith.constant 0 : index
      %c0_9 = arith.constant 0 : index
      %17 = vector.load %arg15[%c0_8, %c0_9] : memref<16x50xf32, #tpu.memory_space<vmem>>, vector<16x50xf32>
      tpu.vector_store %arg15[%c0_8, %c0_9], %16 {strides = array<i32>} : memref<16x50xf32, #tpu.memory_space<vmem>>, vector<16x50xf32>,
    } else {
    }
    %3 = arith.index_cast %arg0 : i32 to index
    %4 = memref.load %arg3[%3] : memref<3xi32, #tpu.memory_space<smem>>
    %5 = arith.cmpi slt, %arg1, %4 : i32
    %6 = arith.extui %5 : i1 to i32
    %c0_i32_1 = arith.constant 0 : i32
    %7 = arith.cmpi ne, %6, %c0_i32_1 : i32
    scf.if %7 {
      %c16_i32 = arith.constant 16 : i32
      %11 = arith.muli %arg0, %c16_i32 : i32
      %12 = tpu.iota {dimensions = array<i32: 0>} : vector<16x1xi32>
      %13 = vector.broadcast %11 : i32 to vector<16x1xi32>
      %14 = arith.addi %13, %12 : vector<16x1xi32>
      %c0 = arith.constant 0 : index
      %c0_3 = arith.constant 0 : index
      %15 = vector.load %arg6[%c0, %c0_3] : memref<1x128xi32, #tpu.memory_space<vmem>>, vector<1x128xi32>
      %16 = vector.broadcast %14 : vector<16x1xi32> to vector<16x128xi32>
      %17 = vector.broadcast %15 : vector<1x128xi32> to vector<16x128xi32>
      %18 = arith.cmpi eq, %16, %17 : vector<16x128xi32>
      %19 = arith.extui %18 : vector<16x128xi1> to vector<16x128xi32>
      %20 = arith.sitofp %19 : vector<16x128xi32> to vector<16x128xf32>
      %21 = arith.truncf %20 : vector<16x128xf32> to vector<16x128xbf16>
      %c0_4 = arith.constant 0 : index
      %c0_5 = arith.constant 0 : index
      %22 = vector.load %arg5[%c0_4, %c0_5] : memref<128x2xf32, #tpu.memory_space<vmem>>, vector<128x2xf32>
      %c0_6 = arith.constant 0 : index
      %c0_7 = arith.constant 0 : index
      %23 = vector.load %arg8[%c0_6, %c0_7] : memref<2x50xf32, #tpu.memory_space<vmem>>, vector<2x50xf32>
      %cst = arith.constant dense<0.000000e+00> : vector<128x50xf32>
      %24 = tpu.matmul %22, %23, %cst {dimension_numbers = #tpu.dot_dimension_numbers<[1], [0], [0], [1], [0, 0, 1, 1], [], []>} : vector<128x2xf32>, vector<2x50xf32>, vector<128x50xf32> -> vector<128x50xf32>
      %25 = arith.truncf %24 : vector<128x50xf32> to vector<128x50xbf16>
      %26 = arith.extf %25 : vector<128x50xbf16> to vector<128x50xf32>
      %27 = arith.subf %24, %26 : vector<128x50xf32>
      %28 = arith.truncf %27 : vector<128x50xf32> to vector<128x50xbf16>
      %c0_8 = arith.constant 0 : index
      %c0_9 = arith.constant 0 : index
      %29 = vector.load %arg15[%c0_8, %c0_9] : memref<16x50xf32, #tpu.memory_space<vmem>>, vector<16x50xf32>
      %cst_10 = arith.constant dense<0.000000e+00> : vector<16x50xf32>
      %30 = tpu.matmul %21, %25, %cst_10 {dimension_numbers = #tpu.dot_dimension_numbers<[1], [0], [0], [1], [0, 0, 1, 1], [], []>} : vector<16x128xbf16>, vector<128x50xbf16>, vector<16x50xf32> -> vector<16x50xf32>
      %cst_11 = arith.constant dense<0.000000e+00> : vector<16x50xf32>
      %31 = tpu.matmul %21, %28, %cst_11 {dimension_numbers = #tpu.dot_dimension_numbers<[1], [0], [0], [1], [0, 0, 1, 1], [], []>} : vector<16x128xbf16>, vector<128x50xbf16>, vector<16x50xf32> -> vector<16x50xf32>
      %32 = arith.addf %30, %31 : vector<16x50xf32>
      %33 = arith.addf %29, %32 : vector<16x50xf32>
      %c0_12 = arith.constant 0 : index
      %c0_13 = arith.constant 0 : index
      %34 = vector.load %arg15[%c0_12, %c0_13] : memref<16x50xf32, #tpu.memory_space<vmem>>, vector<16x50xf32>
      tpu.vector_store %arg15[%c0_12, %c0_13], %33 {strides = array<i32>} : memref<16x50xf32, #tpu.memory_space<vmem>>, vector<16x50xf32>,
    } else {
    }
    %c1_i32 = arith.constant 1 : i32
    %8 = arith.cmpi eq, %arg1, %c1_i32 : i32
    %9 = arith.extui %8 : i1 to i32
    %c0_i32_2 = arith.constant 0 : i32
    %10 = arith.cmpi ne, %9, %c0_i32_2 : i32
    scf.if %10 {
      %c0 = arith.constant 0 : index
      %c0_3 = arith.constant 0 : index
      %11 = vector.load %arg15[%c0, %c0_3] : memref<16x50xf32, #tpu.memory_space<vmem>>, vector<16x50xf32>
      %cst = arith.constant 0.000000e+00 : f32
      %12 = vector.broadcast %cst : f32 to vector<16x50xf32>
      %13 = arith.maximumf %11, %12 : vector<16x50xf32>
      %c0_4 = arith.constant 0 : index
      %c0_5 = arith.constant 0 : index
      %14 = vector.load %arg10[%c0_4, %c0_5] : memref<50x20xf32, #tpu.memory_space<vmem>>, vector<50x20xf32>
      %cst_6 = arith.constant dense<0.000000e+00> : vector<16x20xf32>
      %15 = tpu.matmul %13, %14, %cst_6 {dimension_numbers = #tpu.dot_dimension_numbers<[1], [0], [0], [1], [0, 0, 1, 1], [], []>} : vector<16x50xf32>, vector<50x20xf32>, vector<16x20xf32> -> vector<16x20xf32>
      %c0_7 = arith.constant 0 : index
      %c0_8 = arith.constant 0 : index
      %16 = vector.load %arg11[%c0_7, %c0_8] : memref<1x20xf32, #tpu.memory_space<vmem>>, vector<1x20xf32>
      %17 = vector.broadcast %16 : vector<1x20xf32> to vector<16x20xf32>
      %18 = arith.addf %15, %17 : vector<16x20xf32>
      %cst_9 = arith.constant 0.000000e+00 : f32
      %19 = vector.broadcast %cst_9 : f32 to vector<16x20xf32>
      %20 = arith.maximumf %18, %19 : vector<16x20xf32>
      %c0_10 = arith.constant 0 : index
      %c0_11 = arith.constant 0 : index
      %21 = vector.load %arg12[%c0_10, %c0_11] : memref<1x20xf32, #tpu.memory_space<vmem>>, vector<1x20xf32>
      %22 = vector.broadcast %21 : vector<1x20xf32> to vector<16x20xf32>
      %23 = arith.mulf %20, %22 : vector<16x20xf32>
      %cst_12 = arith.constant dense<0.000000e+00> : vector<16xf32>
      %24 = vector.multi_reduction <add>, %23, %cst_12 [1] : vector<16x20xf32> to vector<16xf32>
      %25 = vector.shape_cast %24 : vector<16xf32> to vector<16x1xf32>
      %c0_13 = arith.constant 0 : index
      %c0_14 = arith.constant 0 : index
      %26 = vector.load %arg13[%c0_13, %c0_14] : memref<1x1xf32, #tpu.memory_space<vmem>>, vector<1x1xf32>
      %27 = vector.broadcast %26 : vector<1x1xf32> to vector<16x1xf32>
      %28 = arith.addf %25, %27 : vector<16x1xf32>
      %c0_15 = arith.constant 0 : index
      %c0_16 = arith.constant 0 : index
      %29 = vector.load %arg14[%c0_15, %c0_16] : memref<16x1xf32, #tpu.memory_space<vmem>>, vector<16x1xf32>
      tpu.vector_store %arg14[%c0_15, %c0_16], %28 {strides = array<i32>} : memref<16x1xf32, #tpu.memory_space<vmem>>, vector<16x1xf32>,
    } else {
    }
    return
  }
  func.func @transform_0(%arg0: i32, %arg1: i32, %arg2: memref<3xi32, #tpu.memory_space<smem>>, %arg3: memref<3xi32, #tpu.memory_space<smem>>) -> (i32, i32) {
    %c0_i32 = arith.constant 0 : i32
    %c0_i32_0 = arith.constant 0 : i32
    return %arg0, %c0_i32 : i32, i32
  }
  func.func @transform_1(%arg0: i32, %arg1: i32, %arg2: memref<3xi32, #tpu.memory_space<smem>>, %arg3: memref<3xi32, #tpu.memory_space<smem>>) -> (i32, i32) {
    %0 = arith.index_cast %arg0 : i32 to index
    %1 = memref.load %arg3[%0] : memref<3xi32, #tpu.memory_space<smem>>
    %c1_i32 = arith.constant 1 : i32
    %2 = arith.subi %1, %c1_i32 : i32
    %c0_i32 = arith.constant 0 : i32
    %3 = arith.maxsi %2, %c0_i32 : i32
    %4 = arith.minsi %arg1, %3 : i32
    %5 = arith.index_cast %arg0 : i32 to index
    %6 = memref.load %arg2[%5] : memref<3xi32, #tpu.memory_space<smem>>
    %7 = arith.addi %6, %4 : i32
    %c2_i32 = arith.constant 2 : i32
    %8 = arith.minsi %7, %c2_i32 : i32
    %c0_i32_0 = arith.constant 0 : i32
    %c0_i32_1 = arith.constant 0 : i32
    return %8, %c0_i32_0 : i32, i32
  }
  func.func @transform_2(%arg0: i32, %arg1: i32, %arg2: memref<3xi32, #tpu.memory_space<smem>>, %arg3: memref<3xi32, #tpu.memory_space<smem>>) -> (i32, i32) {
    %0 = arith.index_cast %arg0 : i32 to index
    %1 = memref.load %arg3[%0] : memref<3xi32, #tpu.memory_space<smem>>
    %c1_i32 = arith.constant 1 : i32
    %2 = arith.subi %1, %c1_i32 : i32
    %c0_i32 = arith.constant 0 : i32
    %3 = arith.maxsi %2, %c0_i32 : i32
    %4 = arith.minsi %arg1, %3 : i32
    %5 = arith.index_cast %arg0 : i32 to index
    %6 = memref.load %arg2[%5] : memref<3xi32, #tpu.memory_space<smem>>
    %7 = arith.addi %6, %4 : i32
    %c2_i32 = arith.constant 2 : i32
    %8 = arith.minsi %7, %c2_i32 : i32
    %c0_i32_0 = arith.constant 0 : i32
    %c0_i32_1 = arith.constant 0 : i32
    return %c0_i32_0, %8 : i32, i32
  }
  func.func @transform_3(%arg0: i32, %arg1: i32, %arg2: memref<3xi32, #tpu.memory_space<smem>>, %arg3: memref<3xi32, #tpu.memory_space<smem>>) -> (i32, i32) {
    %c0_i32 = arith.constant 0 : i32
    %c0_i32_0 = arith.constant 0 : i32
    %c0_i32_1 = arith.constant 0 : i32
    return %c0_i32, %c0_i32_0 : i32, i32
  }
  func.func @transform_4(%arg0: i32, %arg1: i32, %arg2: memref<3xi32, #tpu.memory_space<smem>>, %arg3: memref<3xi32, #tpu.memory_space<smem>>) -> (i32, i32) {
    %c0_i32 = arith.constant 0 : i32
    %c0_i32_0 = arith.constant 0 : i32
    %c0_i32_1 = arith.constant 0 : i32
    return %c0_i32, %c0_i32_0 : i32, i32
  }
  func.func @transform_5(%arg0: i32, %arg1: i32, %arg2: memref<3xi32, #tpu.memory_space<smem>>, %arg3: memref<3xi32, #tpu.memory_space<smem>>) -> (i32, i32) {
    %c0_i32 = arith.constant 0 : i32
    %c0_i32_0 = arith.constant 0 : i32
    %c0_i32_1 = arith.constant 0 : i32
    return %c0_i32, %c0_i32_0 : i32, i32
  }
  func.func @transform_6(%arg0: i32, %arg1: i32, %arg2: memref<3xi32, #tpu.memory_space<smem>>, %arg3: memref<3xi32, #tpu.memory_space<smem>>) -> (i32, i32) {
    %c0_i32 = arith.constant 0 : i32
    %c0_i32_0 = arith.constant 0 : i32
    %c0_i32_1 = arith.constant 0 : i32
    return %c0_i32, %c0_i32_0 : i32, i32
  }
  func.func @transform_7(%arg0: i32, %arg1: i32, %arg2: memref<3xi32, #tpu.memory_space<smem>>, %arg3: memref<3xi32, #tpu.memory_space<smem>>) -> (i32, i32) {
    %c0_i32 = arith.constant 0 : i32
    %c0_i32_0 = arith.constant 0 : i32
    %c0_i32_1 = arith.constant 0 : i32
    return %c0_i32, %c0_i32_0 : i32, i32
  }
  func.func @transform_8(%arg0: i32, %arg1: i32, %arg2: memref<3xi32, #tpu.memory_space<smem>>, %arg3: memref<3xi32, #tpu.memory_space<smem>>) -> (i32, i32) {
    %c0_i32 = arith.constant 0 : i32
    %c0_i32_0 = arith.constant 0 : i32
    %c0_i32_1 = arith.constant 0 : i32
    return %c0_i32, %c0_i32_0 : i32, i32
  }
  func.func @transform_9(%arg0: i32, %arg1: i32, %arg2: memref<3xi32, #tpu.memory_space<smem>>, %arg3: memref<3xi32, #tpu.memory_space<smem>>) -> (i32, i32) {
    %c0_i32 = arith.constant 0 : i32
    %c0_i32_0 = arith.constant 0 : i32
    %c0_i32_1 = arith.constant 0 : i32
    return %c0_i32, %c0_i32_0 : i32, i32
  }
  func.func @transform_10(%arg0: i32, %arg1: i32, %arg2: memref<3xi32, #tpu.memory_space<smem>>, %arg3: memref<3xi32, #tpu.memory_space<smem>>) -> (i32, i32) {
    %c0_i32 = arith.constant 0 : i32
    %c0_i32_0 = arith.constant 0 : i32
    return %arg0, %c0_i32 : i32, i32
  }
}

</mosaic_0001>

<bundles_post_ra>
// kernel: _vertex_update_pallas.1
= control target key start
LH: loop header
LB: loop body
LE: loop exit
PB: predicated region body
PF: predicated region fallthrough
CT: control target
= control target key end

     0   :  { %s1850_s0 = inlined_call_operand.vmem [shape: s32[3], index: 0, kind: input, shape index: {}]   ;;  %s1851_s2 = inlined_call_operand.vmem [shape: f32[48,3], index: 2, kind: input, shape index: {}]   ;;  %s1852_s3 = inlined_call_operand.vmem [shape: f32[384,2], index: 3, kind: input, shape index: {}]   ;;  %s1853_s4 = inlined_call_operand.vmem [shape: s32[1,384], index: 4, kind: input, shape index: {}]   ;;  %s1854_s5 = inlined_call_operand.vmem [shape: f32[3,50], index: 5, kind: input, shape index: {}]   ;;  %s1855_s6 = inlined_call_operand.vmem [shape: f32[2,50], index: 6, kind: input, shape index: {}]   ;;  %s1856_s7 = inlined_call_operand.vmem [shape: f32[1,50], index: 7, kind: input, shape index: {}]   ;;  %s1857_s8 = inlined_call_operand.vmem [shape: f32[50,20], index: 8, kind: input, shape index: {}]   ;;  %s1858_s9 = inlined_call_operand.vmem [shape: f32[1,20], index: 9, kind: input, shape index: {}]   ;;  %s1859_s10 = inlined_call_operand.vmem [shape: f32[1,20], index: 10, kind: input, shape index: {}]   ;;  %s1860_s12 = inlined_call_operand.vmem [shape: f32[48,1], index: 12, kind: output, shape index: {}]   ;;  %s1861_s1 = inlined_call_operand.vmem [shape: s32[3], index: 1, kind: input, shape index: {}]   ;;  %s1862_s11 = inlined_call_operand.<no memory space> [shape: f32[1,1], index: 11, kind: input, shape index: {}]  }
   0x1   :  { %s17_s23 = sshll.u32 %s1850_s0, 4  ;;  %s21_s26 = sshll.u32 %s1861_s1, 4  ;;  %v25_v0 = vstv %s1862_s11  ;;  %s18_s23 = int_to_ptr.vmem [resolvable:$true] %s17_s23  ;;  %s22_s26 = int_to_ptr.vmem [resolvable:$true] %s21_s26 }
   0x2   :  { %26 = vst [vmem:[#allocation6] sm:$0x1] %v25_v0  ;;  %s1524_s29 = scalar_lea.vmem %s18_s23, 16  ;;  %p1529_p1 = scmp.lt.s32.totalorder %s18_s23, %s18_s23 }
   0x3   :  { %p1525_p0 = scmp.ne.s32.totalorder %s18_s23, %s1524_s29  ;;  %p1530_p2 = scmp.lt.s32.totalorder %s1524_s29, %s1524_s29 }
   0x5   :  { %p1531_p3 = por %p1530_p2, %p1529_p1 }
   0x7   :  { %p1532_p4 = pnand %p1531_p3, %p1525_p0 }
   0x9   :  { %1535 = shalt.err (!%p1532_p4)  }
   0xa   :  { %s1590_s30 = smov [#allocation4]   ;;  %s1536_s0 = scalar_lea.vmem %s22_s26, 16 }
   0xb   :  { %20 = dma.vmem_to_smem %s18_s23, 16, %s1590_s30, [#allocation3] }
   0xc   :  { %p1537_p5 = scmp.ne.s32.totalorder %s22_s26, %s1536_s0  ;;  %p1541_p6 = scmp.lt.s32.totalorder %s22_s26, %s22_s26 }
   0xd   :  { %p1542_p7 = scmp.lt.s32.totalorder %s1536_s0, %s1536_s0 }
   0xf   :  { %p1543_p8 = por %p1542_p7, %p1541_p6 }
  0x11   :  { %p1544_p9 = pnand %p1543_p8, %p1537_p5 }
  0x13   :  { %1547 = shalt.err (!%p1544_p9)  }
  0x14   :  { %s1591_s1 = smov [#allocation5]  }
  0x15   :  { %24 = dma.vmem_to_smem %s22_s26, 16, %s1591_s1, [#allocation3] }
  0x16   :  { %1568 = dma.done.wait [#allocation3], 32 }
  0x17   :  { %1569 = vsyncadd [#allocation3], 4294967264 }
  0x18   :  { %28 = sfence }
  0x19   :  { %s1669_s11 = smov 0   ;;  %s1671_s13 = smov 0  }
  0x1a   :  { %s1673_s14 = smov 0   ;;  %s1675_s15 = smov 0  }
  0x1b   :  { %s1677_s16 = smov 0  }
  0x1c LB: > { %s43_s17 = sadd.s32 1, %s1580_s14  ;;  %s46_s18 = sadd.s32 1, %s1584_s15  ;;  %s1588_s16 = sphi %s1677_s16, %s34_s16   ;;  %s1584_s15 = sphi %s1675_s15, %s1868_s15   ;;  %s1580_s14 = sphi %s1673_s14, %s1867_s14   ;;  %s1576_s13 = sphi %s1671_s13, %s1866_s13   ;;  %s1572_s11 = sphi %s1669_s11, %s1865_s11  }
  0x1d   : > { %p44_p10 = scmp.ge.s32.totalorder %s43_s17, 2  ;;  %p1280_p11 = scmp.ge.s32.totalorder %s1588_s16, 1 }
  0x1e   : > { %p438_p12 = scmp.lt.s32.totalorder %s1588_s16, 7 }
  0x1f   : > { %s1870_s17 = smov (%p44_p10, %s43_s17), 0  ;;  %s1872_s18 = smov (!%p44_p10, %s46_s18), %s1584_s15 }
  0x20   : > { %p439_p13 = pnand %p1280_p11, %p438_p12  ;;  %p48_p0 = scmp.ge.s32.totalorder %s1872_s18, 3 }
  0x21   : > { %s1281_s19 = sshll.u32 (!%p439_p13), %s1576_s13, 1  ;;  %s510_s20 = sld [smem:[#allocation5 + %s1576_s13]] (!%p439_p13) }
  0x22   : > { %s1874_s18 = smov (%p48_p0, %s1872_s18), 0  ;;  %442 = sbr.rel (%p439_p13) target bundleno = 1130 (0x46a), region = 60 }
  0x23   : > { %1863 = sst [smem:[#allocation8_spill]] %s1874_s18  ;;  %p505_p1 = scmp.lt.s32.totalorder (!%p439_p13), %s1281_s19, 5 }
  0x24   : > { %s536_s21 = sld [smem:[#allocation5 + %s1576_s13]] (!%p439_p13)  ;;  %p1292_p9 = scmp.ne.s32.totalorder (!%p439_p13), %s1572_s11, 0 }
  0x25   : > { %s516_s23 = sld [smem:[#allocation4 + %s1576_s13]] (!%p439_p13) }
  0x26   : > { %s542_s1 = sld [smem:[#allocation4 + %s1576_s13]] (!%p439_p13) }
  0x27   : > { %s1283_s27 = sadd.s32 (!%p439_p13), 4294967295, %s510_s20 }
  0x28   : > { %p512_p2 = scmp.gt.s32.totalorder (!%p439_p13), %s1283_s27, 0 }
  0x29   : > { %s1876_s19 = smov (!%p505_p1, %s1281_s19), 5  ;;  %v572_v1 = vld [vmem:[%s1854_s5] sm:$0x7] (!%p1292_p9)  ;;  %vm587_vm0 = vcmask (!%p1292_p9), 1042432   ;;  %vm580_vm1 = vcmask (!%p1292_p9), 23552   ;;  %vm666_vm2 = vcmask (!%p1292_p9), 408576  }
  0x2a   : > { %s1282_s22 = sshll.u32 %s1876_s19, 3  ;;  %s1286_s0 = sadd.s32 4294967295, %s536_s21  ;;  %1379 = vmatprep.subr.msk.mxu0 (!%p1292_p9), %vm587_vm0, %v572_v1  ;;  %v1293_v4 = vld [vmem:[%s1856_s7] ss:$0 sm:$0xff] (!%p1292_p9) }
  0x2b   : > { %s1710_s26 = scalar_lea.vmem %s1851_s2, %s1282_s22  ;;  %s1715_s30 = scalar_lea.vmem %s1860_s12, %s1282_s22  ;;  %1380 = vmatpush3.msk.msra.mxu0 (!%p1292_p9), %vm587_vm0, %v572_v1 }
  0x2c   : > { %s1878_s27 = smov (!%p512_p2, %s1283_s27), 0  ;;  %p538_p3 = scmp.gt.s32.totalorder %s1286_s0, 0  ;;  %v570_v2 = vld [vmem:[%s1710_s26] sm:$0xff] (!%p1292_p9)  ;;  %v571_v3 = vld [vmem:[%s1710_s26 + $0x8] sm:$0xff] (!%p1292_p9) }
  0x2d   : > { %p514_p4 = scmp.lt.s32.totalorder %s1572_s11, %s1878_s27  ;;  %1381 = vmatprep.mubr.msk.f32.mxu0 (!%p1292_p9), %vm580_vm1, %v570_v2 }
  0x2e   : > { %s1880_s0 = smov (!%p538_p3, %s1286_s0), 0  ;;  %1382 = vmatmul.mubr.msk.f32.vlgmr.msra.gmra.mrb[0].mxu0 (!%p1292_p9), %vm580_vm1, %v571_v3 }
  0x2f   : > { %s515_s19 = scalar_select %p514_p4, %s1572_s11, %s1878_s27 }
  0x30   : > { %p540_p5 = scmp.lt.s32.totalorder %s1572_s11, %s1880_s0 }
  0x31   : > { %s517_s18 = sadd.s32 %s516_s23, %s515_s19 }
  0x32   : > { %p518_p6 = scmp.lt.s32.totalorder %s517_s18, 2 }
  0x33   : > { %s541_s24 = scalar_select %p540_p5, %s1572_s11, %s1880_s0 }
  0x34   : > { %s1882_s18 = smov (!%p518_p6, %s517_s18), 2  ;;  %569 = sbr.rel (%p1292_p9) target bundleno = 262 (0x106), region = 64 }
  0x35   : > { %s543_s25 = sadd.s32 %s542_s1, %s541_s24  ;;  %s1284_s20 = sshll.u32 %s1882_s18, 4 }
  0x36   : > { %p544_p7 = scmp.lt.s32.totalorder %s543_s25, 2  ;;  %p521_p8 = scmp.lt.s32.totalorder %s1284_s20, 47 }
  0x38   : > { %s1884_s25 = smov (!%p544_p7, %s543_s25), 2  ;;  %s1886_s20 = smov (!%p521_p8, %s1284_s20), 47 }
  0x39   : > { %s1888_s25 = smov (!%p544_p7, %s1884_s25), 2  ;;  %s1285_s21 = sshll.u32 %s1886_s20, 3 }
  0x3a   : > { %s1727_s29 = scalar_lea.vmem %s1852_s3, %s1285_s21  ;;  %s548_s0 = scalar_lea.vmem %s1853_s4, %s1888_s25 }
 0x101   : > { %v1383_v5 = vpop.f32.mrb[0].mxu0 }
 0x102   : > { %v663_v6 = vadd.f32 %v1383_v5, %v1293_v4  ;;  %v657_v7 = vpop.f32.mrb[1].mxu0 }
 0x103   : > { %v658_v8 = vadd.f32 %v1293_v4, %v657_v7 }
 0x104   : > { %668 = vst.msk [vmem:[#allocation2 + $0x8] sm:$0xff] %vm666_vm2, %v663_v6 }
 0x105   : > { %667 = vst.msk [vmem:[#allocation2] sm:$0xff] %vm666_vm2, %v658_v8 }
 0x106 PF: > { %s669_s20 = sld [smem:[#allocation5 + %s1576_s13]] }
 0x10c   : > { %p1297_p10 = scmp.ge.s32.totalorder %s1572_s11, %s669_s20 }
 0x10d   : > { %v709_v9 = vld [vmem:[%s1855_s6] sm:$0x3] (!%p1297_p10)  ;;  %vm759_vm3 = vcmask (!%p1297_p10), 1041408   ;;  %vm710_vm4 = vcmask (!%p1297_p10), 15360   ;;  %v694_v11 = vld [vmem:[%s1727_s29 + $0x8] sm:$0xff] (!%p1297_p10)  ;;  %v695_v12 = vld [vmem:[%s1727_s29 + $0x10] sm:$0xff] (!%p1297_p10)  ;;  %v675_v50 = vlaneseq (!%p1297_p10) }
 0x10e   : > { %673 = sbr.rel (%p1297_p10) target bundleno = 743 (0x2e7), region = 68  ;;  %v693_v10 = vld [vmem:[%s1727_s29] sm:$0xff] (!%p1297_p10)  ;;  %1384 = vmatprep.subr.msk.mxu0 (!%p1297_p10), %vm759_vm3, %v709_v9  ;;  %v696_v13 = vld [vmem:[%s1727_s29 + $0x18] sm:$0xff] (!%p1297_p10)  ;;  %v698_v15 = vld [vmem:[%s1727_s29 + $0x28] sm:$0xff] (!%p1297_p10)  ;;  %v1592_v26 = vmov (!%p1297_p10), 0.0   ;;  %vm1593_vm5 = vmmov (!%p1297_p10), 0  }
 0x10f   : > { %1386 = vmatprep.mubr.msk.f32.mxu0 (!%p1297_p10), %vm710_vm4, %v693_v10  ;;  %1385 = vmatpush3.msk.msra.mxu0 (!%p1297_p10), %vm759_vm3, %v709_v9  ;;  %v697_v14 = vld [vmem:[%s1727_s29 + $0x20] sm:$0xff] (!%p1297_p10)  ;;  %v699_v16 = vld [vmem:[%s1727_s29 + $0x30] sm:$0xff] (!%p1297_p10)  ;;  %v700_v17 = vld [vmem:[%s1727_s29 + $0x38] sm:$0xff] (!%p1297_p10)  ;;  %v676_v59 = vshrl.u32 (!%p1297_p10), %v675_v50, 7  ;;  %s1298_s22 = sshll.u32 (!%p1297_p10), %s1576_s13, 4  ;;  %vm1042_vm9 = vcmask (!%p1297_p10), 408576  }
 0x110   : > { %1387 = vmatmul.mubr.msk.f32.vlgmr.msra.gmra.mrb[0].mxu0 (!%p1297_p10), %vm710_vm4, %v694_v11  ;;  %v701_v18 = vld [vmem:[%s1727_s29 + $0x40] sm:$0xff] (!%p1297_p10)  ;;  %v702_v19 = vld [vmem:[%s1727_s29 + $0x48] sm:$0xff] (!%p1297_p10)  ;;  %v703_v20 = vld [vmem:[%s1727_s29 + $0x50] sm:$0xff] (!%p1297_p10)  ;;  %1430 = vmatprep.subr.bf16.mxu0 (!%p1297_p10), %v1592_v26  ;;  %v678_v8 = vstv (!%p1297_p10), %s1298_s22 }
 0x111   : > { %1389 = vmatprep.mubr.msk.f32.mxu0 (!%p1297_p10), %vm710_vm4, %v695_v12  ;;  %v704_v21 = vld [vmem:[%s1727_s29 + $0x58] sm:$0xff] (!%p1297_p10)  ;;  %v705_v22 = vld [vmem:[%s1727_s29 + $0x60] sm:$0xff] (!%p1297_p10)  ;;  %v706_v23 = vld [vmem:[%s1727_s29 + $0x68] sm:$0xff] (!%p1297_p10)  ;;  %1410 = vmatprep.subr.bf16.mxu1 (!%p1297_p10), %v1592_v26  ;;  %v677_v4 = vadd.s32 (!%p1297_p10), 8, %v676_v59 }
 0x112   : > { %v707_v24 = vld [vmem:[%s1727_s29 + $0x70] sm:$0xff] (!%p1297_p10)  ;;  %v708_v25 = vld [vmem:[%s1727_s29 + $0x78] sm:$0xff] (!%p1297_p10)  ;;  %1426 = vmatprep.mubr.msk.bf16.mxu1 (!%p1297_p10), %vm1593_vm5, %v1592_v26 }
 0x114   : > { %1390 = vmatmul.mubr.msk.f32.gmra.mrb[2].mxu0 (!%p1297_p10), %vm710_vm4, %v696_v13 }
 0x115   : > { %1392 = vmatprep.mubr.msk.f32.mxu0 %vm710_vm4, %v697_v14  ;;  %v679_v14 = vadd.s32 %v678_v8, %v676_v59 }
 0x118   : > { %1393 = vmatmul.mubr.msk.f32.gmra.mrb[4].mxu0 %vm710_vm4, %v698_v15  ;;  %v680_v15 = vadd.s32 %v678_v8, %v677_v4 }
 0x119   : > { %1395 = vmatprep.mubr.msk.f32.mxu0 %vm710_vm4, %v699_v16 }
 0x11c   : > { %1396 = vmatmul.mubr.msk.f32.gmra.mrb[6].mxu0 %vm710_vm4, %v700_v17 }
 0x11d   : > { %1398 = vmatprep.mubr.msk.f32.mxu0 %vm710_vm4, %v701_v18 }
 0x120   : > { %1399 = vmatmul.mubr.msk.f32.gmra.mrb[8].mxu0 %vm710_vm4, %v702_v19  ;;  %v1299_v19 = vld [vmem:[%s548_s0] ss:$0 sm:$0xff] }
 0x121   : > { %1401 = vmatprep.mubr.msk.f32.mxu0 %vm710_vm4, %v703_v20  ;;  %vm686_vm6 = vcmp.eq.s32.totalorder %v679_v14, %v1299_v19  ;;  %vm687_vm7 = vcmp.eq.s32.totalorder %v680_v15, %v1299_v19 }
 0x122   : > { %vm1319_vm8 = vmpackc.low %vm687_vm7, %vm686_vm6 }
 0x124   : > { %1402 = vmatmul.mubr.msk.f32.gmra.mrb[10].mxu0 %vm710_vm4, %v704_v21 }
 0x125   : > { %1404 = vmatprep.mubr.msk.f32.mxu0 %vm710_vm4, %v705_v22 }
 0x128   : > { %1405 = vmatmul.mubr.msk.f32.gmra.mrb[12].mxu0 %vm710_vm4, %v706_v23 }
 0x129   : > { %1407 = vmatprep.mubr.msk.f32.mxu0 %vm710_vm4, %v707_v24 }
 0x12c   : > { %1408 = vmatmul.mubr.msk.f32.gmra.mrb[14].mxu0 %vm710_vm4, %v708_v25 }
 0x12d   : > { %1446 = vmatprep.mubr.msk.bf16.mxu0 %vm1593_vm5, %v1592_v26 }
 0x1e3   : > { %v1388_v27 = vpop.f32.mrb[0].mxu0 }
 0x1e4   : > { %v829_v28 = vpop.f32.mrb[1].mxu0 }
 0x1e5   : > { %v908_v29 = vpack.c.bf16 %v1388_v27, %v829_v28 }
 0x1e7   : > { %v916_v30 = vunpack.c.l.bf16 %v908_v29  ;;  %v1391_v31 = vpop.f32.mrb[2].mxu0  ;;  %1431 = vmatpush3.bf16.msra.mxu0 %v908_v29  ;;  %v917_v32 = vunpack.c.h.bf16 %v908_v29 }
 0x1e8   : > { %v839_v33 = vpop.f32.mrb[3].mxu0  ;;  %1432 = vmatprep.subr.bf16.mxu0 %v1592_v26 }
 0x1e9   : > { %v932_v34 = vsub.f32 %v829_v28, %v916_v30  ;;  %v909_v35 = vpack.c.bf16 %v1391_v31, %v839_v33  ;;  %v933_v36 = vsub.f32 %v1388_v27, %v917_v32 }
 0x1eb   : > { %v918_v37 = vunpack.c.l.bf16 %v909_v35  ;;  %v919_v38 = vunpack.c.h.bf16 %v909_v35  ;;  %v1394_v39 = vpop.f32.mrb[4].mxu0  ;;  %1433 = vmatpush3.bf16.msra.mxu0 %v909_v35  ;;  %v948_v40 = vpack.c.bf16 %v933_v36, %v932_v34  ;;  %v1594_v34 = vmov 1.0|1.0  }
 0x1ec   : > { %v849_v41 = vpop.f32.mrb[5].mxu0  ;;  %1434 = vmatprep.subr.bf16.mxu0 %v1592_v26 }
 0x1ed   : > { %v934_v42 = vsub.f32 %v839_v33, %v918_v37  ;;  %v935_v43 = vsub.f32 %v1391_v31, %v919_v38  ;;  %v910_v44 = vpack.c.bf16 %v1394_v39, %v849_v41  ;;  %1411 = vmatpush3.bf16.msra.mxu1 %v948_v40  ;;  %v956_v40 = vld [vmem:[#allocation2] sm:$0xff] }
 0x1ee   : > { %1412 = vmatprep.subr.bf16.mxu1 %v1592_v26 }
 0x1ef   : > { %v949_v45 = vpack.c.bf16 %v935_v43, %v934_v42  ;;  %v920_v46 = vunpack.c.l.bf16 %v910_v44  ;;  %v921_v47 = vunpack.c.h.bf16 %v910_v44  ;;  %v1397_v48 = vpop.f32.mrb[6].mxu0  ;;  %1435 = vmatpush3.bf16.msra.mxu0 %v910_v44  ;;  %v957_v44 = vld [vmem:[#allocation2 + $0x8] sm:$0xff] }
 0x1f0   : > { %v859_v49 = vpop.f32.mrb[7].mxu0  ;;  %1436 = vmatprep.subr.bf16.mxu0 %v1592_v26 }
 0x1f1   : > { %v936_v51 = vsub.f32 %v849_v41, %v920_v46  ;;  %v937_v52 = vsub.f32 %v1394_v39, %v921_v47  ;;  %v911_v53 = vpack.c.bf16 %v1397_v48, %v859_v49  ;;  %1413 = vmatpush3.bf16.msra.mxu1 %v949_v45 }
 0x1f2   : > { %1414 = vmatprep.subr.bf16.mxu1 %v1592_v26 }
 0x1f3   : > { %v950_v54 = vpack.c.bf16 %v937_v52, %v936_v51  ;;  %v922_v55 = vunpack.c.l.bf16 %v911_v53  ;;  %v923_v56 = vunpack.c.h.bf16 %v911_v53  ;;  %v1400_v57 = vpop.f32.mrb[8].mxu0  ;;  %1437 = vmatpush3.bf16.msra.mxu0 %v911_v53 }
 0x1f4   : > { %v869_v58 = vpop.f32.mrb[9].mxu0  ;;  %1438 = vmatprep.subr.bf16.mxu0 %v1592_v26 }
 0x1f5   : > { %v938_v60 = vsub.f32 %v859_v49, %v922_v55  ;;  %v939_v61 = vsub.f32 %v1397_v48, %v923_v56  ;;  %v912_v62 = vpack.c.bf16 %v1400_v57, %v869_v58  ;;  %1415 = vmatpush3.bf16.msra.mxu1 %v950_v54 }
 0x1f6   : > { %1416 = vmatprep.subr.bf16.mxu1 %v1592_v26 }
 0x1f7   : > { %v951_v63 = vpack.c.bf16 %v939_v61, %v938_v60  ;;  %v924_v0 = vunpack.c.l.bf16 %v912_v62  ;;  %v925_v1 = vunpack.c.h.bf16 %v912_v62  ;;  %v1403_v2 = vpop.f32.mrb[10].mxu0  ;;  %1439 = vmatpush3.bf16.msra.mxu0 %v912_v62 }
 0x1f8   : > { %v879_v3 = vpop.f32.mrb[11].mxu0  ;;  %1440 = vmatprep.subr.bf16.mxu0 %v1592_v26 }
 0x1f9   : > { %v940_v5 = vsub.f32 %v869_v58, %v924_v0  ;;  %v941_v6 = vsub.f32 %v1400_v57, %v925_v1  ;;  %v913_v7 = vpack.c.bf16 %v1403_v2, %v879_v3  ;;  %1417 = vmatpush3.bf16.msra.mxu1 %v951_v63 }
 0x1fa   : > { %1418 = vmatprep.subr.bf16.mxu1 %v1592_v26 }
 0x1fb   : > { %v952_v9 = vpack.c.bf16 %v941_v6, %v940_v5  ;;  %v926_v10 = vunpack.c.l.bf16 %v913_v7  ;;  %v927_v11 = vunpack.c.h.bf16 %v913_v7  ;;  %v1406_v12 = vpop.f32.mrb[12].mxu0  ;;  %1441 = vmatpush3.bf16.msra.mxu0 %v913_v7 }
 0x1fc   : > { %v889_v13 = vpop.f32.mrb[13].mxu0  ;;  %1442 = vmatprep.subr.bf16.mxu0 %v1592_v26 }
 0x1fd   : > { %v942_v16 = vsub.f32 %v879_v3, %v926_v10  ;;  %v943_v17 = vsub.f32 %v1403_v2, %v927_v11  ;;  %v914_v18 = vpack.c.bf16 %v1406_v12, %v889_v13  ;;  %1419 = vmatpush3.bf16.msra.mxu1 %v952_v9 }
 0x1fe   : > { %1420 = vmatprep.subr.bf16.mxu1 %v1592_v26 }
 0x1ff   : > { %v953_v20 = vpack.c.bf16 %v943_v17, %v942_v16  ;;  %v928_v21 = vunpack.c.l.bf16 %v914_v18  ;;  %v929_v22 = vunpack.c.h.bf16 %v914_v18  ;;  %v1409_v23 = vpop.f32.mrb[14].mxu0  ;;  %1443 = vmatpush3.bf16.msra.mxu0 %v914_v18 }
 0x200   : > { %v899_v24 = vpop.f32.mrb[15].mxu0  ;;  %1444 = vmatprep.subr.bf16.mxu0 %v1592_v26 }
 0x201   : > { %v944_v25 = vsub.f32 %v889_v13, %v928_v21  ;;  %v945_v27 = vsub.f32 %v1406_v12, %v929_v22  ;;  %v915_v28 = vpack.c.bf16 %v1409_v23, %v899_v24  ;;  %1421 = vmatpush3.bf16.msra.mxu1 %v953_v20 }
 0x202   : > { %1422 = vmatprep.subr.bf16.mxu1 %v1592_v26 }
 0x203   : > { %v954_v29 = vpack.c.bf16 %v945_v27, %v944_v25  ;;  %v930_v30 = vunpack.c.l.bf16 %v915_v28  ;;  %v931_v31 = vunpack.c.h.bf16 %v915_v28  ;;  %1445 = vmatpush3.bf16.msra.mxu0 %v915_v28 }
 0x205   : > { %v946_v32 = vsub.f32 %v899_v24, %v930_v30  ;;  %v947_v33 = vsub.f32 %v1409_v23, %v931_v31  ;;  %1423 = vmatpush3.bf16.msra.mxu1 %v954_v29 }
 0x206   : > { %1424 = vmatprep.subr.bf16.mxu1 %v1592_v26  ;;  %1447 = vmatmul.mubr.msk.bf16.vlgmr.msra.gmra.mrb[16].mxu0 %vm1319_vm8, %v1594_v34 }
 0x207   : > { %v955_v35 = vpack.c.bf16 %v947_v33, %v946_v32 }
 0x209   : > { %1425 = vmatpush3.bf16.msra.mxu1 %v955_v35 }
 0x20c   : > { %1427 = vmatmul.mubr.msk.bf16.vlgmr.msra.gmra.mrb[0].mxu1 %vm1319_vm8, %v1594_v34 }
 0x2d9   : > { %v1033_v36 = vpop.f32.mrb[16].mxu0 }
 0x2da   : > { %v1448_v37 = vpop.f32.mrb[17].mxu0 }
 0x2db   : > { %v1036_v38 = vpop.f32.mrb[18].mxu0 }
 0x2dc   : > { %v1449_v39 = vpop.f32.mrb[19].mxu0 }
 0x2df   : > { %v992_v41 = vpop.f32.mrb[0].mxu1 }
 0x2e0   : > { %v1034_v42 = vadd.f32 %v1033_v36, %v992_v41  ;;  %v1428_v43 = vpop.f32.mrb[1].mxu1 }
 0x2e1   : > { %v995_v45 = vpop.f32.mrb[2].mxu1 }
 0x2e2   : > { %v1040_v46 = vadd.f32 %v1034_v42, %v956_v40  ;;  %v1037_v47 = vadd.f32 %v1036_v38, %v995_v45  ;;  %v1429_v48 = vpop.f32.mrb[3].mxu1 }
 0x2e4   : > { %1043 = vst.msk [vmem:[#allocation2] sm:$0xff] %vm1042_vm9, %v1040_v46  ;;  %v1041_v26 = vadd.f32 %v1037_v47, %v957_v44 }
 0x2e6   : > { %1044 = vst.msk [vmem:[#allocation2 + $0x8] sm:$0xff] %vm1042_vm9, %v1041_v26 }
 0x2e7 PF: > { %p1323_p11 = scmp.ne.s32.totalorder %s1572_s11, 1 }
 0x2e8   : > { %v1053_v49 = vld [vmem:[%s1857_s8] sm:$0xff] (!%p1323_p11)  ;;  %v1054_v50 = vld [vmem:[%s1857_s8 + $0x8] sm:$0xff] (!%p1323_p11)  ;;  %v1055_v51 = vld [vmem:[%s1857_s8 + $0x10] sm:$0xff] (!%p1323_p11)  ;;  %vm1067_vm10 = vcmask (!%p1323_p11), 408576   ;;  %vm1074_vm11 = vcmask (!%p1323_p11), 1041408   ;;  %vm1164_vm12 = vcmask (!%p1323_p11), 162816  }
 0x2e9   : > { %1048 = sbr.rel (%p1323_p11) target bundleno = 1130 (0x46a), region = 72  ;;  %v1467_v52 = vpack.c.bf16 (!%p1323_p11), %v1054_v50, %v1053_v49  ;;  %v1056_v53 = vld [vmem:[%s1857_s8 + $0x18] sm:$0xff] (!%p1323_p11)  ;;  %v1057_v55 = vld [vmem:[%s1857_s8 + $0x20] sm:$0xff] (!%p1323_p11)  ;;  %v1058_v56 = vld [vmem:[%s1857_s8 + $0x28] sm:$0xff] (!%p1323_p11)  ;;  %vm1180_vm13 = vcmask (!%p1323_p11), 7168  }
 0x2ea   : > { %v1471_v54 = vpack.c.bf16 (!%p1323_p11), %v1056_v53, %v1055_v51  ;;  %v1475_v59 = vpack.c.bf16 (!%p1323_p11), %v1058_v56, %v1057_v55  ;;  %v1059_v60 = vld [vmem:[%s1857_s8 + $0x30] sm:$0x3] (!%p1323_p11)  ;;  %v1324_v63 = vld [vmem:[%s1858_s9] ss:$0 sm:$0xff] (!%p1323_p11) }
 0x2eb   : > { %v1049_v57 = vld [vmem:[#allocation2] sm:$0xff] (!%p1323_p11)  ;;  %1468 = vmatprep.subr.bf16.mxu0 (!%p1323_p11), %v1467_v52  ;;  %v1329_v11 = vld [vmem:[#allocation6] ss:$0 sm:$0xff] (!%p1323_p11) }
 0x2ec   : > { %v1051_v58 = vmax.f32 (!%p1323_p11), %v1049_v57, 0.0  ;;  %1470 = vmatpush3.bf16.msra.mxu0 (!%p1323_p11), %v1467_v52  ;;  %v1328_v4 = vld [vmem:[%s1859_s10] ss:$0 sm:$0xff] (!%p1323_p11) }
 0x2ed   : > { %1472 = vmatprep.subr.bf16.mxu0 (!%p1323_p11), %v1471_v54  ;;  %v1050_v61 = vld [vmem:[#allocation2 + $0x8] sm:$0xff] (!%p1323_p11) }
 0x2ee   : > { %1464 = vmatprep.mubr.msk.f32.mxu0 (!%p1323_p11), %vm1067_vm10, %v1051_v58  ;;  %v1052_v62 = vmax.f32 (!%p1323_p11), %v1050_v61, 0.0 }
 0x2f0   : > { %1474 = vmatpush3.bf16.msra.mxu0 %v1471_v54 }
 0x2f1   : > { %1476 = vmatprep.subr.bf16.mxu0 %v1475_v59 }
 0x2f4   : > { %1478 = vmatpush3.bf16.msra.mxu0 %v1475_v59 }
 0x2f5   : > { %1462 = vmatprep.subr.msk.mxu0 %vm1074_vm11, %v1059_v60 }
 0x2f8   : > { %1463 = vmatpush3.msk.msra.mxu0 %vm1074_vm11, %v1059_v60 }
 0x2f9   : > { %1465 = vmatmul.mubr.msk.f32.vlgmr.msra.gmra.mrb[0].mxu0 %vm1067_vm10, %v1052_v62 }
 0x3cc   : > { %v1466_v0 = vpop.f32.mrb[0].mxu0 }
 0x3cd   : > { %v1150_v1 = vadd.f32 %v1466_v0, %v1324_v63  ;;  %v1144_v2 = vpop.f32.mrb[1].mxu0 }
 0x3ce   : > { %v1145_v3 = vadd.f32 %v1324_v63, %v1144_v2 }
 0x3cf   : > { %v1154_v5 = vmax.f32 %v1150_v1, 0.0 }
 0x3d0   : > { %v1153_v6 = vmax.f32 %v1145_v3, 0.0 }
 0x3d1   : > { %v1163_v9 = vmul.f32 %v1328_v4, %v1154_v5 }
 0x3d2   : > { %v1162_v7 = vmul.f32 %v1328_v4, %v1153_v6 }
 0x3d3   : > { %v1168_v10 = vsel %vm1164_vm12, %v1163_v9, 0.0 }
 0x3d4   : > { %v1165_v8 = vsel %vm1164_vm12, %v1162_v7, 0.0 }
 0x3d5   : > { %1166 = vadd.xlane.f32.xlu0 %v1165_v8 }
 0x3d9   : > { %1169 = vadd.xlane.f32.xlu0 %v1168_v10 }
 0x462   : > { %v1167_v12 = vpop.xlane.xlu0 %1166 }
 0x463   : > { %v1178_v13 = vadd.f32 %v1329_v11, %v1167_v12 }
 0x465   : > { %1181 = vst.msk [vmem:[%s1715_s30] sm:$0xff] %vm1180_vm13, %v1178_v13 }
 0x466   : > { %v1170_v14 = vpop.xlane.xlu0 %1169 }
 0x467   : > { %v1179_v15 = vadd.f32 %v1329_v11, %v1170_v14 }
 0x469   : > { %1182 = vst.msk [vmem:[%s1715_s30 + $0x8] sm:$0xff] %vm1180_vm13, %v1179_v15 }
 0x46a PF: > { %s34_s16 = sadd.s32 1, %s1588_s16   ;;  %s1864_s27 = sld [smem:[#allocation8_spill]] }
 0x46b   : > { %p31_p12 = scmp.ge.s32.totalorder %s34_s16, 8   ;;  %s1865_s11 = smov %s1580_s14 }
 0x46c   : > { %s1866_s13 = smov %s1584_s15  ;;  %s1867_s14 = smov %s1870_s17 }
 0x46d   :  { %33 = sbr.rel (!%p31_p12) target bundleno = 28 (0x1c), region = 108 }
 0x470   : > { %s1868_s15 = smov %s1864_s27 }

</bundles_post_ra>
